<compile_context>
chip_gen: v5e
topology: v5e:2x2
jax: 0.10.0
libtpu: 0.0.40
codegen_flags: <defaults>
</compile_context>

<pallas_src>
import functools

import jax
import jax.numpy as jnp
from jax.experimental import pallas as pl
from jax.experimental.pallas import tpu as pltpu


def channel_attention_kernel(x_ref, w1t_ref, w2t_ref, out_ref,
                             sum_sc, max_sc, *, hw_true, hw_tile):
    # x_ref   : (bB, C, hw_tile) block of NCHW input with spatial flattened
    # w1t_ref : (C, Ch)   == Conv2d(C, C//16, 1).weight squeezed, transposed
    # w2t_ref : (Ch, C)   == Conv2d(C//16, C, 1).weight squeezed, transposed
    # out_ref : (bB, C)   == (bB, C, 1, 1) squeezed
    # sum_sc  : (bB, C) f32 partial-sum accumulator (VMEM scratch)
    # max_sc  : (bB, C) f32 running-max accumulator (VMEM scratch)
    k = pl.program_id(1)
    n_k = pl.num_programs(1)

    @pl.when(k == 0)
    def _init():
        sum_sc[...] = jnp.zeros_like(sum_sc)
        max_sc[...] = jnp.full_like(max_sc, -jnp.inf)

    x = x_ref[...].astype(jnp.float32)            # (bB, C, hw_tile)

    # Ragged last tile: wrapper zero-pads HW (neutral for the sum); mask the
    # max branch with -inf. Emitted only when statically ragged.
    if (hw_true % hw_tile) != 0:
        pos = k * hw_tile + jax.lax.broadcasted_iota(jnp.int32, x.shape, 2)
        valid = pos < hw_true
        x_sum = jnp.where(valid, x, 0.0)
        x_max = jnp.where(valid, x, -jnp.inf)
    else:
        x_sum = x
        x_max = x

    # Steady state: one VPU add + one VPU max per vreg (memory-bound).
    sum_sc[...] += jnp.sum(x_sum, axis=-1)
    max_sc[...] = jnp.maximum(max_sc[...], jnp.max(x_max, axis=-1))

    @pl.when(k == n_k - 1)
    def _finalize():
        avg = sum_sc[...] * jnp.float32(1.0 / hw_true)        # (bB, C)
        mx = max_sc[...]                                      # (bB, C)
        # Fuse both pooling branches into one matmul pair: (2*bB, C).
        pooled = jnp.concatenate([avg, mx], axis=0)
        h = jnp.maximum(
            jnp.dot(pooled, w1t_ref[...], preferred_element_type=jnp.float32),
            0.0)                                              # (2*bB, Ch)
        o = jnp.dot(h, w2t_ref[...], preferred_element_type=jnp.float32)
        b_blk = avg.shape[0]
        o = o[:b_blk] + o[b_blk:]                             # (bB, C)
        out_ref[...] = jax.nn.sigmoid(o).astype(out_ref.dtype)


def _round_up(v, m):
    return ((v + m - 1) // m) * m


def channel_attention(x, w1, w2, *, hw_tile=512):
    """x: (B, C, H, W) NCHW; w1: (C//16, C); w2: (C, C//16). Returns (B, C, 1, 1)."""
    B, C, H, W = x.shape
    Ch = w1.shape[0]
    HW = H * W

    # Lane-aligned spatial tile (multiple of 128), clamped to the padded extent.
    hw_tile = max(128, (hw_tile // 128) * 128)
    hw_tile = min(hw_tile, _round_up(HW, 128))
    hw_pad = _round_up(HW, hw_tile)
    n_hw = hw_pad // hw_tile

    # Batch blocking: keeps the leading ("parallel") grid axis available for
    # megacore sharding at production batch sizes without violating the
    # (8, 128) block constraint on the 2D output.
    b_tile = 8 if (B % 8 == 0) else B
    n_b = B // b_tile

    x_flat = x.reshape(B, C, HW)
    if hw_pad != HW:
        # Zero padding is neutral for the sum; the max branch is masked in-kernel.
        x_flat = jnp.pad(x_flat, ((0, 0), (0, 0), (0, hw_pad - HW)))

    # Pre-transpose the weights once in the wrapper (no in-kernel XLU transpose).
    w1t = jnp.transpose(w1)   # (C, Ch)
    w2t = jnp.transpose(w2)   # (Ch, C)

    kernel = functools.partial(channel_attention_kernel,
                               hw_true=HW, hw_tile=hw_tile)

    out = pl.pallas_call(
        kernel,
        out_shape=jax.ShapeDtypeStruct((B, C), x.dtype),
        grid_spec=pltpu.PrefetchScalarGridSpec(
            num_scalar_prefetch=0,
            grid=(n_b, n_hw),
            in_specs=[
                pl.BlockSpec((b_tile, C, hw_tile), lambda b, k: (b, 0, k)),
                pl.BlockSpec((C, Ch), lambda b, k: (0, 0)),
                pl.BlockSpec((Ch, C), lambda b, k: (0, 0)),
            ],
            out_specs=pl.BlockSpec((b_tile, C), lambda b, k: (b, 0)),
            scratch_shapes=[
                pltpu.VMEM((b_tile, C), jnp.float32),   # partial sum
                pltpu.VMEM((b_tile, C), jnp.float32),   # running max
            ],
        ),
        compiler_params=pltpu.CompilerParams(
            dimension_semantics=("parallel", "arbitrary"),
            vmem_limit_bytes=32 * 1024 * 1024,          # safe on v7x (64 MiB VMEM)
        ),
    )(x_flat, w1t, w2t)

    return out.reshape(B, C, 1, 1)


def reference(x, w1, w2):
    """Plain-JAX reference mirroring the PyTorch ChannelAttention forward."""
    avg = jnp.mean(x, axis=(2, 3))                      # (B, C)
    mx = jnp.max(x, axis=(2, 3))                        # (B, C)

    def fc(p):
        h = jnp.maximum(p @ w1.T, 0.0)                  # (B, C//16)
        return h @ w2.T                                 # (B, C)

    o = fc(avg) + fc(mx)
    return jax.nn.sigmoid(o)[:, :, None, None]          # (B, C, 1, 1)


if __name__ == "__main__":
    key = jax.random.PRNGKey(0)
    k_x, k_w1, k_w2 = jax.random.split(key, 3)

    B, C, H, W = 2, 32, 16, 16        # in_planes=32 -> hidden = 32 // 16 = 2
    Ch = C // 16

    x = jax.random.normal(k_x, (B, C, H, W), dtype=jnp.float32)
    # Conv2d(C, C//16, 1, bias=False).weight has shape (C//16, C, 1, 1); use
    # the squeezed (C//16, C) matrix. Deterministic synthetic init.
    w1 = 0.1 * jax.random.normal(k_w1, (Ch, C), dtype=jnp.float32)
    w2 = 0.1 * jax.random.normal(k_w2, (C, Ch), dtype=jnp.float32)

    # hw_tile=128 -> two grid steps along HW, exercising the accumulate/
    # finalize reduction path (production shapes would use 512-1024).
    out = channel_attention(x, w1, w2, hw_tile=128)
    out = jax.block_until_ready(out)

    ref = reference(x, w1, w2)
    assert out.shape == (B, C, 1, 1), out.shape
    assert jnp.allclose(out, ref, atol=1e-5, rtol=1e-5), (
        float(jnp.max(jnp.abs(out - ref))))

    print("KERNEL_OK")
</pallas_src>

<mosaic_0001>
module attributes {stable_mosaic.version = 11 : i64} {
  func.func @channel_attention_kernel(%arg0: i32, %arg1: i32, %arg2: memref<2x32x128xf32, #tpu.memory_space<vmem>>, %arg3: memref<32x2xf32, #tpu.memory_space<vmem>>, %arg4: memref<2x32xf32, #tpu.memory_space<vmem>>, %arg5: memref<2x32xf32, #tpu.memory_space<vmem>>, %arg6: memref<2x32xf32, #tpu.memory_space<vmem>>, %arg7: memref<2x32xf32, #tpu.memory_space<vmem>>) attributes {dimension_semantics = [#tpu.dimension_semantics<parallel>, #tpu.dimension_semantics<arbitrary>], iteration_bounds = array<i64: 1, 2>, scalar_prefetch = 0 : i64, scratch_operands = 2 : i64, tpu.core_type = #tpu.core_type<tc>, window_params = [{transform_indices = @transform_0, window_bounds = array<i64: 2, 32, 128>}, {pipeline_mode = #tpu.pipeline_mode<synchronous>, transform_indices = @transform_1, window_bounds = array<i64: 32, 2>}, {pipeline_mode = #tpu.pipeline_mode<synchronous>, transform_indices = @transform_2, window_bounds = array<i64: 2, 32>}, {transform_indices = @transform_3, window_bounds = array<i64: 2, 32>}]} {
    %c0_i32 = arith.constant 0 : i32
    %0 = arith.cmpi eq, %arg1, %c0_i32 : i32
    %1 = arith.extui %0 : i1 to i32
    %c0_i32_0 = arith.constant 0 : i32
    %2 = arith.cmpi ne, %1, %c0_i32_0 : i32
    scf.if %2 {
      %cst_13 = arith.constant 0.000000e+00 : f32
      %15 = vector.broadcast %cst_13 : f32 to vector<2x32xf32>
      %c0_14 = arith.constant 0 : index
      %c0_15 = arith.constant 0 : index
      %16 = vector.load %arg6[%c0_14, %c0_15] : memref<2x32xf32, #tpu.memory_space<vmem>>, vector<2x32xf32>
      tpu.vector_store %arg6[%c0_14, %c0_15], %15 {strides = array<i32>} : memref<2x32xf32, #tpu.memory_space<vmem>>, vector<2x32xf32>,
      %cst_16 = arith.constant 0xFF800000 : f32
      %17 = vector.broadcast %cst_16 : f32 to vector<2x32xf32>
      %c0_17 = arith.constant 0 : index
      %c0_18 = arith.constant 0 : index
      %18 = vector.load %arg7[%c0_17, %c0_18] : memref<2x32xf32, #tpu.memory_space<vmem>>, vector<2x32xf32>
      tpu.vector_store %arg7[%c0_17, %c0_18], %17 {strides = array<i32>} : memref<2x32xf32, #tpu.memory_space<vmem>>, vector<2x32xf32>,
    } else {
    }
    %c0 = arith.constant 0 : index
    %c0_1 = arith.constant 0 : index
    %c0_2 = arith.constant 0 : index
    %3 = vector.load %arg2[%c0, %c0_1, %c0_2] : memref<2x32x128xf32, #tpu.memory_space<vmem>>, vector<2x32x128xf32>
    %c0_3 = arith.constant 0 : index
    %c0_4 = arith.constant 0 : index
    %4 = vector.load %arg6[%c0_3, %c0_4] : memref<2x32xf32, #tpu.memory_space<vmem>>, vector<2x32xf32>
    %cst = arith.constant dense<0.000000e+00> : vector<2x32xf32>
    %5 = vector.multi_reduction <add>, %3, %cst [2] : vector<2x32x128xf32> to vector<2x32xf32>
    %6 = arith.addf %4, %5 : vector<2x32xf32>
    %c0_5 = arith.constant 0 : index
    %c0_6 = arith.constant 0 : index
    %7 = vector.load %arg6[%c0_5, %c0_6] : memref<2x32xf32, #tpu.memory_space<vmem>>, vector<2x32xf32>
    tpu.vector_store %arg6[%c0_5, %c0_6], %6 {strides = array<i32>} : memref<2x32xf32, #tpu.memory_space<vmem>>, vector<2x32xf32>,
    %c0_7 = arith.constant 0 : index
    %c0_8 = arith.constant 0 : index
    %8 = vector.load %arg7[%c0_7, %c0_8] : memref<2x32xf32, #tpu.memory_space<vmem>>, vector<2x32xf32>
    %cst_9 = arith.constant dense<0xFF800000> : vector<2x32xf32>
    %9 = vector.multi_reduction <maximumf>, %3, %cst_9 [2] : vector<2x32x128xf32> to vector<2x32xf32>
    %10 = arith.maximumf %8, %9 : vector<2x32xf32>
    %c0_10 = arith.constant 0 : index
    %c0_11 = arith.constant 0 : index
    %11 = vector.load %arg7[%c0_10, %c0_11] : memref<2x32xf32, #tpu.memory_space<vmem>>, vector<2x32xf32>
    tpu.vector_store %arg7[%c0_10, %c0_11], %10 {strides = array<i32>} : memref<2x32xf32, #tpu.memory_space<vmem>>, vector<2x32xf32>,
    %c1_i32 = arith.constant 1 : i32
    %12 = arith.cmpi eq, %arg1, %c1_i32 : i32
    %13 = arith.extui %12 : i1 to i32
    %c0_i32_12 = arith.constant 0 : i32
    %14 = arith.cmpi ne, %13, %c0_i32_12 : i32
    scf.if %14 {
      %c0_13 = arith.constant 0 : index
      %c0_14 = arith.constant 0 : index
      %15 = vector.load %arg6[%c0_13, %c0_14] : memref<2x32xf32, #tpu.memory_space<vmem>>, vector<2x32xf32>
      %cst_15 = arith.constant 3.906250e-03 : f32
      %16 = vector.broadcast %cst_15 : f32 to vector<2x32xf32>
      %17 = arith.mulf %15, %16 : vector<2x32xf32>
      %c0_16 = arith.constant 0 : index
      %c0_17 = arith.constant 0 : index
      %18 = vector.load %arg7[%c0_16, %c0_17] : memref<2x32xf32, #tpu.memory_space<vmem>>, vector<2x32xf32>
      %19 = tpu.concatenate %17, %18 in 0 : vector<2x32xf32>, vector<2x32xf32> -> vector<4x32xf32>
      %c0_18 = arith.constant 0 : index
      %c0_19 = arith.constant 0 : index
      %20 = vector.load %arg3[%c0_18, %c0_19] : memref<32x2xf32, #tpu.memory_space<vmem>>, vector<32x2xf32>
      %cst_20 = arith.constant dense<0.000000e+00> : vector<4x2xf32>
      %21 = tpu.matmul %19, %20, %cst_20 {dimension_numbers = #tpu.dot_dimension_numbers<[1], [0], [0], [1], [0, 0, 1, 1], [], []>} : vector<4x32xf32>, vector<32x2xf32>, vector<4x2xf32> -> vector<4x2xf32>
      %cst_21 = arith.constant 0.000000e+00 : f32
      %22 = vector.broadcast %cst_21 : f32 to vector<4x2xf32>
      %23 = arith.maximumf %21, %22 : vector<4x2xf32>
      %c0_22 = arith.constant 0 : index
      %c0_23 = arith.constant 0 : index
      %24 = vector.load %arg4[%c0_22, %c0_23] : memref<2x32xf32, #tpu.memory_space<vmem>>, vector<2x32xf32>
      %cst_24 = arith.constant dense<0.000000e+00> : vector<4x32xf32>
      %25 = tpu.matmul %23, %24, %cst_24 {dimension_numbers = #tpu.dot_dimension_numbers<[1], [0], [0], [1], [0, 0, 1, 1], [], []>} : vector<4x2xf32>, vector<2x32xf32>, vector<4x32xf32> -> vector<4x32xf32>
      %26 = vector.extract_strided_slice %25 {offsets = [0, 0], sizes = [2, 32], strides = [1, 1]} : vector<4x32xf32> to vector<2x32xf32>
      %27 = vector.extract_strided_slice %25 {offsets = [2, 0], sizes = [2, 32], strides = [1, 1]} : vector<4x32xf32> to vector<2x32xf32>
      %28 = arith.addf %26, %27 : vector<2x32xf32>
      %29 = arith.negf %28 : vector<2x32xf32>
      %30 = math.exp %29 : vector<2x32xf32>
      %cst_25 = arith.constant 1.000000e+00 : f32
      %31 = vector.broadcast %cst_25 : f32 to vector<2x32xf32>
      %32 = arith.addf %31, %30 : vector<2x32xf32>
      %33 = arith.divf %31, %32 : vector<2x32xf32>
      %c0_26 = arith.constant 0 : index
      %c0_27 = arith.constant 0 : index
      %34 = vector.load %arg5[%c0_26, %c0_27] : memref<2x32xf32, #tpu.memory_space<vmem>>, vector<2x32xf32>
      tpu.vector_store %arg5[%c0_26, %c0_27], %33 {strides = array<i32>} : memref<2x32xf32, #tpu.memory_space<vmem>>, vector<2x32xf32>,
    } else {
    }
    return
  }
  func.func @transform_0(%arg0: i32, %arg1: i32) -> (i32, i32, i32) {
    %c0_i32 = arith.constant 0 : i32
    %c0_i32_0 = arith.constant 0 : i32
    return %arg0, %c0_i32, %arg1 : i32, i32, i32
  }
  func.func @transform_1(%arg0: i32, %arg1: i32) -> (i32, i32) {
    %c0_i32 = arith.constant 0 : i32
    %c0_i32_0 = arith.constant 0 : i32
    %c0_i32_1 = arith.constant 0 : i32
    return %c0_i32, %c0_i32_0 : i32, i32
  }
  func.func @transform_2(%arg0: i32, %arg1: i32) -> (i32, i32) {
    %c0_i32 = arith.constant 0 : i32
    %c0_i32_0 = arith.constant 0 : i32
    %c0_i32_1 = arith.constant 0 : i32
    return %c0_i32, %c0_i32_0 : i32, i32
  }
  func.func @transform_3(%arg0: i32, %arg1: i32) -> (i32, i32) {
    %c0_i32 = arith.constant 0 : i32
    %c0_i32_0 = arith.constant 0 : i32
    return %arg0, %c0_i32 : i32, i32
  }
}

</mosaic_0001>

<bundles_post_ra>
// kernel: tpu_custom_call.1
= control target key start
LH: loop header
LB: loop body
LE: loop exit
PB: predicated region body
PF: predicated region fallthrough
CT: control target
= control target key end

     0   :  { %8 = vsyncpa [#allocation5], 0  ;;  %s831_s0 = inlined_call_operand.hbm [shape: f32[2,32,256], index: 0, kind: input, shape index: {}]   ;;  %s832_s1 = inlined_call_operand.vmem [shape: f32[32,2], index: 1, kind: input, shape index: {}]   ;;  %s833_s2 = inlined_call_operand.vmem [shape: f32[2,32], index: 2, kind: input, shape index: {}]   ;;  %s834_s3 = inlined_call_operand.hbm [shape: f32[2,32], index: 3, kind: output, shape index: {}]  }
   0x1   :  { %10 = vsyncpa [#allocation5 + $0x1], 0 }
   0x2   :  { %11 = vsyncpa [#allocation6], 0  ;;  %s707_s12 = smov 0   ;;  %s709_s13 = smov 0  }
   0x3   :  { %s711_s14 = smov 0   ;;  %s713_s15 = smov 0  }
   0x4   :  { %s715_s16 = smov 0   ;;  %s717_s17 = smov 0  }
   0x5 LB: > { %s479_s18 = sadd.s32 4294967295, %s679_s17   ;;  %s26_s19 = sadd.s32 1, %s675_s16  ;;  %s679_s17 = sphi %s717_s17, %s17_s17   ;;  %s675_s16 = sphi %s715_s16, %s841_s16   ;;  %s671_s15 = sphi %s713_s15, %s840_s15   ;;  %s667_s14 = sphi %s711_s14, %s839_s14   ;;  %s663_s13 = sphi %s709_s13, %s838_s13   ;;  %s659_s12 = sphi %s707_s12, %s837_s12  }
   0x6   : > { %p27_p0 = scmp.ge.s32.totalorder %s26_s19, 2  ;;  %s38_s20 = sadd.s32 1, %s667_s14 }
   0x7   : > { %p45_p1 = scmp.ne.s32.totalorder %s667_s14, %s663_s13  ;;  %p46_p2 = scmp.eq.s32.totalorder %s679_s17, 0 }
   0x8   : > { %s843_s19 = smov (%p27_p0, %s26_s19), 0  ;;  %p51_p4 = scmp.ne.s32.totalorder %s663_s13, %s659_s12 }
   0x9   : > { %p743_p3 = por %p46_p2, %p45_p1  ;;  %s34_s22 = ssub.s32 %s675_s16, %s843_s19 }
   0xa   : > { %p52_p5 = scmp.eq.s32.totalorder %s479_s18, 0  ;;  %p36_p6 = scmp.eq.s32.totalorder %s34_s22, 0 }
   0xb   : > { %p506_p8 = scmp.lt.s32.totalorder %s679_s17, 2  ;;  %s149_s25 = sand.u32 1, %s667_s14  }
   0xc   : > { %p752_p7 = por %p52_p5, %p51_p4  ;;  %s483_s26 = sshll.u32 %s675_s16, 3 }
   0xd   : > { %s758_s24 = scalar_select %p36_p6, %s667_s14, %s38_s20  }
   0xe   : > { %s482_s27 = sshll.u32 %s149_s25, 6  ;;  %s160_s30 = scalar_lea.hbm %s831_s0, %s483_s26 }
   0xf   : > { %s161_s4 = sshll.u32 %s160_s30, 4  ;;  %s153_s5 = scalar_lea.vmem [#allocation4], %s482_s27  ;;  %s162_s4 = int_to_ptr.hbm [resolvable:$true] %s161_s4 }
  0x10   : > { %s163_s6 = sshll.u32 %s153_s5, 4  ;;  %p503_p9 = pnand %p506_p8, %p743_p3  ;;  %s164_s6 = int_to_ptr.vmem [resolvable:$true] %s163_s6 }
  0x11   : > { %p484_p10 = scmp.ge.s32.totalorder %s679_s17, 1  ;;  %s150_s7 = scalar_lea.sflag [#allocation5], %s149_s25 }
  0x12   : > { %s681_s8 = smov 256   ;;  %s682_s9 = smov 128  }
  0x13   : > { %s683_s10 = smov 8   ;;  %p171_p11 = scmp.lt.s32.totalorder %s679_s17, 3 }
  0x14   : > { %505 = dma.hbm_to_vmem [thread:$0]  (!%p503_p9), %s162_s4, 1024, %s164_s6, %s150_s7, %s681_s8, %s682_s9, %s683_s10  }
  0x15   : > { %p172_p12 = pnand %p484_p10, %p171_p11 }
  0x16   : > { %s177_s11 = sand.u32 (!%p172_p12), 1, %s663_s13  }
  0x17   : > { %175 = sbr.rel (%p172_p12) target bundleno = 507 (0x1fb), region = 32  ;;  %s485_s12 = sshll.u32 (!%p172_p12), %s177_s11, 6 }
  0x18   : > { %s178_s20 = scalar_lea.sflag (!%p172_p12), [#allocation5], %s177_s11  ;;  %s181_s22 = scalar_lea.vmem (!%p172_p12), [#allocation4], %s485_s12 }
  0x1c   : > { %650 = dma.done.wait (%p752_p7), %s178_s20, 1024  }
  0x1d   : > { %652 = vsyncadd (%p752_p7), %s178_s20, 4294966272  ;;  %p486_p13 = scmp.ne.s32.totalorder %s671_s15, 0 }
  0x1f   : > { %204 = sbr.rel (%p486_p13) target bundleno = 39 (0x27), region = 40 }
  0x24   : > { %vm205_vm0 = vcmask 254976   ;;  %v684_v0 = vmov 0.0   ;;  %v685_v1 = vmov -inf  }
  0x25   : > { %206 = vst.msk [vmem:[#allocation2] sm:$0x3] %vm205_vm0, %v684_v0 }
  0x26   : > { %207 = vst.msk [vmem:[#allocation3] sm:$0x3] %vm205_vm0, %v685_v1 }
  0x27 PF: > { %v212_v2 = vld [vmem:[%s181_s22 + $0x20] sm:$0xff]  ;;  %v213_v4 = vld [vmem:[%s181_s22 + $0x28] sm:$0xff]  ;;  %v210_v6 = vld [vmem:[%s181_s22 + $0x10] sm:$0xff]  ;;  %v241_v19 = vlaneseq  ;;  %vm246_vm1 = vcmask 130112   ;;  %vm250_vm2 = vcmask 195712   ;;  %vm254_vm3 = vcmask 261312  }
  0x28   : > { %v208_v3 = vld [vmem:[%s181_s22] sm:$0xff]  ;;  %225 = vadd.xlane.f32.xlu1 %v212_v2  ;;  %v209_v5 = vld [vmem:[%s181_s22 + $0x8] sm:$0xff]  ;;  %v214_v7 = vld [vmem:[%s181_s22 + $0x30] sm:$0xff]  ;;  %vm263_vm4 = vcmask 1041409   ;;  %vm267_vm5 = vcmask 254976   ;;  %p487_p0 = scmp.ne.s32.totalorder %s671_s15, 1 }
  0x29   : > { %270 = vmax.xlane.f32.xlu2 %v208_v3  ;;  %217 = vadd.xlane.f32.xlu0 %v208_v3  ;;  %v215_v8 = vld [vmem:[%s181_s22 + $0x38] sm:$0xff]  ;;  %v242_v20 = vand.u32 127, %v241_v19 }
  0x2a   : > { %v211_v9 = vld [vmem:[%s181_s22 + $0x18] sm:$0xff] }
  0x2b   : > { %v244_v22 = vadd.s32 4294967288, %v242_v20  ;;  %v248_v24 = vadd.s32 4294967280, %v242_v20  ;;  %v252_v28 = vadd.s32 4294967272, %v242_v20 }
  0x2c   : > { %v216_v42 = vld [vmem:[#allocation2] sm:$0x3] }
  0x2d   : > { %v269_v60 = vld [vmem:[#allocation3] sm:$0x3] }
  0x30   : > { %227 = vadd.xlane.f32.xlu1 %v213_v4 }
  0x31   : > { %272 = vmax.xlane.f32.xlu2 %v209_v5  ;;  %219 = vadd.xlane.f32.xlu0 %v209_v5 }
  0x38   : > { %280 = vmax.xlane.f32.xlu1 %v213_v4 }
  0x39   : > { %221 = vadd.xlane.f32.xlu2 %v210_v6  ;;  %278 = vmax.xlane.f32.xlu0 %v212_v2 }
  0x40   : > { %274 = vmax.xlane.f32.xlu1 %v210_v6 }
  0x41   : > { %282 = vmax.xlane.f32.xlu2 %v214_v7  ;;  %229 = vadd.xlane.f32.xlu0 %v214_v7 }
  0x48   : > { %231 = vadd.xlane.f32.xlu1 %v215_v8 }
  0x49   : > { %276 = vmax.xlane.f32.xlu2 %v211_v9  ;;  %223 = vadd.xlane.f32.xlu0 %v211_v9 }
  0x51   : > { %284 = vmax.xlane.f32.xlu0 %v215_v8 }
  0x9b   : > { %v226_v10 = vpop.xlane.xlu1 %225 }
  0x9c   : > { %v271_v11 = vpop.xlane.xlu2 %270  ;;  %v218_v12 = vpop.xlane.xlu0 %217  ;;  %v256_v26 = vperm.slane %v226_v10, %v242_v20 }
  0x9d   : > { %v243_v32 = vperm.slane %v218_v12, %v242_v20  ;;  %v294_v44 = vperm.slane %v271_v11, %v242_v20 }
  0xa3   : > { %v228_v13 = vpop.xlane.xlu1 %227 }
  0xa4   : > { %v273_v14 = vpop.xlane.xlu2 %272  ;;  %v220_v15 = vpop.xlane.xlu0 %219  ;;  %v257_v27 = vperm.slane %v228_v13, %v244_v22 }
  0xa5   : > { %v245_v29 = vperm.slane %v220_v15, %v244_v22  ;;  %v295_v47 = vperm.slane %v273_v14, %v244_v22 }
  0xa6   : > { %v258_v34 = vsel %vm246_vm1, %v257_v27, %v256_v26 }
  0xa7   : > { %v247_v37 = vsel %vm246_vm1, %v245_v29, %v243_v32  ;;  %v296_v55 = vsel %vm246_vm1, %v295_v47, %v294_v44 }
  0xab   : > { %v281_v16 = vpop.xlane.xlu1 %280 }
  0xac   : > { %v222_v17 = vpop.xlane.xlu2 %221  ;;  %v279_v18 = vpop.xlane.xlu0 %278  ;;  %v302_v48 = vperm.slane %v281_v16, %v244_v22 }
  0xad   : > { %v249_v31 = vperm.slane %v222_v17, %v248_v24  ;;  %v301_v49 = vperm.slane %v279_v18, %v242_v20 }
  0xaf   : > { %v251_v40 = vsel %vm250_vm2, %v249_v31, %v247_v37  ;;  %v303_v56 = vsel %vm246_vm1, %v302_v48, %v301_v49 }
  0xb3   : > { %v275_v21 = vpop.xlane.xlu1 %274 }
  0xb4   : > { %v230_v23 = vpop.xlane.xlu0 %229  ;;  %v283_v25 = vpop.xlane.xlu2 %282  ;;  %v297_v51 = vperm.slane %v275_v21, %v248_v24 }
  0xb5   : > { %v259_v30 = vperm.slane %v230_v23, %v248_v24  ;;  %v304_v52 = vperm.slane %v283_v25, %v248_v24 }
  0xb6   : > { %v298_v58 = vsel %vm250_vm2, %v297_v51, %v296_v55 }
  0xb7   : > { %v260_v38 = vsel %vm250_vm2, %v259_v30, %v258_v34  ;;  %v305_v59 = vsel %vm250_vm2, %v304_v52, %v303_v56 }
  0xbb   : > { %v232_v33 = vpop.xlane.xlu1 %231 }
  0xbc   : > { %v261_v35 = vperm.slane %v232_v33, %v252_v28  ;;  %v224_v36 = vpop.xlane.xlu0 %223  ;;  %v277_v45 = vpop.xlane.xlu2 %276 }
  0xbd   : > { %v253_v39 = vperm.slane %v224_v36, %v252_v28  ;;  %v299_v53 = vperm.slane %v277_v45, %v252_v28 }
  0xbe   : > { %v262_v41 = vsel %vm254_vm3, %v261_v35, %v260_v38 }
  0xbf   : > { %v255_v43 = vsel %vm254_vm3, %v253_v39, %v251_v40  ;;  %v300_v61 = vsel %vm254_vm3, %v299_v53, %v298_v58 }
  0xc0   : > { %v264_v46 = vsel %vm263_vm4, %v262_v41, %v255_v43 }
  0xc1   : > { %v266_v50 = vadd.f32 %v264_v46, %v216_v42 }
  0xc3   : > { %268 = vst.msk [vmem:[#allocation2] sm:$0x3] %vm267_vm5, %v266_v50 }
  0xc4   : > { %v285_v54 = vpop.xlane.xlu0 %284 }
  0xc5   : > { %v306_v57 = vperm.slane %v285_v54, %v252_v28 }
  0xc7   : > { %v307_v62 = vsel %vm254_vm3, %v306_v57, %v305_v59  ;;  %315 = sbr.rel (%p487_p0) target bundleno = 501 (0x1f5), region = 44 }
  0xc8   : > { %v308_v63 = vsel %vm263_vm4, %v307_v62, %v300_v61 }
  0xc9   : > { %v310_v0 = vmax.f32 %v269_v60, %v308_v63 }
  0xcb   : > { %311 = vst.msk [vmem:[#allocation3] sm:$0x3] %vm267_vm5, %v310_v0 }
  0xcc   : > { %v327_v1 = vld [vmem:[%s832_s1 + $0x18] sm:$0xff]  ;;  %v326_v2 = vld [vmem:[%s832_s1 + $0x10] sm:$0xff]  ;;  %v316_v3 = vld [vmem:[#allocation2] sm:$0x3]  ;;  %vm322_vm6 = vcmask 1041408   ;;  %vm328_vm7 = vcmask 261120  }
  0xcd   : > { %344 = vmatpush.msra.mxu0 %v327_v1  ;;  %v325_v5 = vld [vmem:[%s832_s1 + $0x8] sm:$0xff]  ;;  %v317_v6 = vmul.f32 0.00390625, %v316_v3  ;;  %v324_v8 = vld [vmem:[%s832_s1] sm:$0xff]  ;;  %vm354_vm8 = vcmask 15360  }
  0xce   : > { %v353_v10 = vld [vmem:[%s833_s2] sm:$0x3] }
  0xcf   : > { %345 = vmatpush.msra.mxu0 %v326_v2  ;;  %489 = vmatpush.msk.msra.mxu1 %vm322_vm6, %v353_v10 }
  0xd1   : > { %346 = vmatpush.msra.mxu0 %v325_v5 }
  0xd2   : > { %v318_v4 = vld [vmem:[#allocation3] sm:$0x3] }
  0xd3   : > { %v320_v7 = vrot.slane %v318_v4, 6  ;;  %347 = vmatpush.msra.mxu0 %v324_v8 }
  0xd5   : > { %v323_v9 = vsel %vm322_vm6, %v317_v6, %v320_v7 }
  0xd6   : > { %488 = vmatmul.msk.f32.vlgmr.msra.gmra.mxu0 %vm328_vm7, %v323_v9 }
 0x153   : > { %v349_v11 = vpop.f32.mrf.mxu0 }
 0x154   : > { %v352_v12 = vmax.f32 %v349_v11, 0.0 }
 0x156   : > { %490 = vmatmul.msk.f32.vlgmr.msra.gmra.mxu1 %vm354_vm8, %v352_v12 }
 0x1d3   : > { %v378_v13 = vpop.f32.mrf.mxu1 }
 0x1d4   : > { %v382_v14 = vrot.slane %v378_v13, 2 }
 0x1d6   : > { %v384_v15 = vadd.f32 %v382_v14, %v378_v13 }
 0x1d8   : > { %v491_v16 = vmul.f32 -1.442695, %v384_v15 }
 0x1da   : > { %563 = vpow2.f32 %v491_v16 }
 0x1e0   : > { %v564_v17 = vpop.eup %563 }
 0x1e1   : > { %v388_v18 = vadd.f32 1.0, %v564_v17 }
 0x1e3   : > { %565 = vrcp.f32 %v388_v18  ;;  %v400_v22 = vand.u32 2147483648, %v388_v18  ;;  %v398_v24 = vand.u32 2147483647, %v388_v18  ;;  %vm394_vm10 = vweird.f32 %v388_v18 }
 0x1e5   : > { %v401_v26 = vor.u32 1.1754944e-38, %v400_v22  ;;  %vm399_vm12 = vcmp.eq.f32.partialorder %v398_v24, 8.507059e+37 }
 0x1e9   : > { %v566_v19 = vpop.eup %565 }
 0x1ea   : > { %v390_v20 = vmul.f32 %v566_v19, %v388_v18  ;;  %vm395_vm9 = vweird.f32 %v566_v19 }
 0x1eb   : > { %vm396_vm11 = vmor %vm394_vm10, %vm395_vm9 }
 0x1ec   : > { %v391_v21 = vsub.f32 1.0, %v390_v20 }
 0x1ee   : > { %v392_v23 = vmul.f32 %v566_v19, %v391_v21 }
 0x1f0   : > { %v393_v25 = vadd.f32 %v566_v19, %v392_v23 }
 0x1f2   : > { %v397_v27 = vsel %vm396_vm11, %v566_v19, %v393_v25 }
 0x1f3   : > { %v402_v28 = vsel %vm399_vm12, %v401_v26, %v397_v27 }
 0x1f4   : > { %404 = vst.msk [vmem:[#allocation7] sm:$0x3] %vm267_vm5, %v402_v28 }
 0x1f5 PF: > { %p507_p1 = scmp.eq.s32.totalorder %s479_s18, 1  ;;  %s415_s7 = sshll.u32 %s834_s3, 4  ;;  %s416_s7 = int_to_ptr.hbm [resolvable:$true] %s415_s7 }
 0x1f6   : > { %s686_s8 = smov [#allocation7]  }
 0x1f7   : > { %s413_s9 = sshll.u32 %s686_s8, 4  ;;  %s414_s9 = int_to_ptr.vmem [resolvable:$true] %s413_s9 }
 0x1f8   : > { %499 = dma.vmem_to_hbm [thread:$0]  (%p507_p1), %s414_s9, 32, %s416_s7, [#allocation6]  }
 0x1f9   : > { %654 = dma.done.wait (%p507_p1), [#allocation6], 32  }
 0x1fa   : > { %656 = vsyncadd (%p507_p1), [#allocation6], 4294967264 }
 0x1fb PF: > { %s17_s17 = sadd.s32 1, %s679_s17   ;;  %s837_s12 = smov %s663_s13 }
 0x1fc   : > { %p14_p2 = scmp.ge.s32.totalorder %s17_s17, 4   ;;  %s838_s13 = smov %s667_s14 }
 0x1fd   : > { %s839_s14 = smov %s758_s24  ;;  %s840_s15 = smov %s675_s16 }
 0x1fe   : > { %s841_s16 = smov %s843_s19  ;;  %16 = sbr.rel (!%p14_p2) target bundleno = 5 (0x5), region = 78 }
 0x203   :  { %429 = vsyncpa [#allocation5], 1 }
 0x204   :  { %431 = vsyncpa [#allocation5 + $0x1], 1 }
 0x205   :  { %432 = vsyncpa [#allocation6], 1 }
 0x206   :  { %434 = vsyncpa [#allocation6 + $0x1], 1 }

</bundles_post_ra>
